<compile_context>
chip_gen: v7x
topology: tpu7x:2x2x1
jax: 0.10.0
libtpu: 0.0.40
codegen_flags: <defaults>
</compile_context>

<pallas_src>
import functools

import jax
import jax.numpy as jnp
from jax.experimental import pallas as pl
from jax.experimental.pallas import tpu as pltpu


# ----------------------------- kernels --------------------------------------


def _ln_rows_kernel(x_ref, g_ref, b_ref, o_ref, *, eps):
    """Lane-dense row layer-norm.

    x_ref/o_ref: (tR, G) with G = C*F on the lane axis; g_ref/b_ref: (1, G).
    """
    x = x_ref[...].astype(jnp.float32)
    mu = jnp.mean(x, axis=-1, keepdims=True)                    # (tR, 1)
    xc = x - mu                                                 # hoisted, reused
    var = jnp.mean(xc * xc, axis=-1, keepdims=True)             # biased (unbiased=False)
    inv_std = jax.lax.rsqrt(var + eps)                          # EUP slot
    y = xc * inv_std * g_ref[...].astype(jnp.float32) + b_ref[...].astype(jnp.float32)
    o_ref[...] = y.astype(o_ref.dtype)                          # single full-tile store


def _ln_nchw_kernel(x_ref, g_ref, b_ref, o_ref, *, eps, inv_n):
    """NCHW-native layer-norm (used when F % 128 == 0, already lane-dense).

    x_ref/o_ref: (1, C, tT, F); g_ref/b_ref: (1, C, 1, F).
    """
    x = x_ref[...].astype(jnp.float32)
    # Reduce over C first (plain vreg adds), then over the lane axis F, so the
    # XLU cross-lane reduce touches C-times less data.
    mu = jnp.sum(jnp.sum(x, axis=1, keepdims=True), axis=3, keepdims=True) * inv_n
    xc = x - mu                                                 # hoisted, reused
    var = jnp.sum(jnp.sum(xc * xc, axis=1, keepdims=True), axis=3, keepdims=True) * inv_n
    inv_std = jax.lax.rsqrt(var + eps)
    y = xc * inv_std * g_ref[...].astype(jnp.float32) + b_ref[...].astype(jnp.float32)
    o_ref[...] = y.astype(o_ref.dtype)


# --------------------------- tiling / sizing ---------------------------------

_MIN_GRID_STEPS = 8  # enough steps for the auto-pipeliner + both v7x TensorCores


def _vmem_capacity_bytes():
    try:
        return int(pltpu.get_tpu_info().vmem_capacity_bytes)
    except Exception:
        return 64 * 1024 * 1024  # assume the smallest (v7x-class) VMEM


def _vmem_limit_bytes():
    phys = _vmem_capacity_bytes()
    # v7x: 64 MiB physical -> leave real headroom; v5e/v6e: 128 MiB -> use more.
    return 36 * 1024 * 1024 if phys <= 64 * 1024 * 1024 else 64 * 1024 * 1024


def _sublane_multiple(itemsize):
    return {4: 8, 2: 16, 1: 32}.get(int(itemsize), 8)


def _pick_tile_rows(n_rows, group, itemsize, *, budget_bytes, min_steps):
    """Rows per block: sublane-aligned, VMEM-budgeted in f32 terms (persistent
    upcast + xc + y temporaries plus double-buffered in/out tiles), and small
    enough to give the pipeline >= min_steps grid steps."""
    sub = _sublane_multiple(itemsize)
    if n_rows <= sub:
        return n_rows                                  # full extent is always legal
    live_bytes_per_row = group * (3 * 4 + 4 * itemsize)  # 3 f32 temps + 2x(in+out) bufs
    cap_vmem = max(1, budget_bytes // live_bytes_per_row)
    cap_grid = max(1, -(-n_rows // max(1, min_steps)))
    t = min(n_rows, cap_vmem, cap_grid)
    t = max(sub, (t // sub) * sub)
    return min(t, n_rows)


# ------------------------------ wrapper --------------------------------------


def layer_norm_4d_cf(x, gamma, beta, eps=1e-5):
    """LayerNormalization4DCF forward. x: (B, C, T, F); gamma/beta: (1, C, 1, F)."""
    B, C, T, F = x.shape
    assert gamma.shape == (1, C, 1, F) and beta.shape == (1, C, 1, F)
    eps = float(eps)
    itemsize = jnp.dtype(x.dtype).itemsize
    vmem_limit = _vmem_limit_bytes()
    budget = (vmem_limit * 2) // 3
    gamma = gamma.astype(jnp.float32)
    beta = beta.astype(jnp.float32)

    if F % 128 == 0:
        # Already lane-dense in NCHW: keep the transpose-free path.
        tT = _pick_tile_rows(T, C * F, itemsize, budget_bytes=budget,
                             min_steps=-(-_MIN_GRID_STEPS // B))
        grid = (B, pl.cdiv(T, tT))
        kernel = functools.partial(_ln_nchw_kernel, eps=eps, inv_n=1.0 / float(C * F))
        return pl.pallas_call(
            kernel,
            out_shape=jax.ShapeDtypeStruct((B, C, T, F), x.dtype),
            grid_spec=pltpu.PrefetchScalarGridSpec(
                num_scalar_prefetch=0,
                grid=grid,
                in_specs=[
                    pl.BlockSpec((1, C, tT, F), lambda b, t: (b, 0, t, 0)),
                    pl.BlockSpec((1, C, 1, F), lambda b, t: (0, 0, 0, 0)),
                    pl.BlockSpec((1, C, 1, F), lambda b, t: (0, 0, 0, 0)),
                ],
                out_specs=pl.BlockSpec((1, C, tT, F), lambda b, t: (b, 0, t, 0)),
            ),
            compiler_params=pltpu.CompilerParams(
                dimension_semantics=("parallel", "parallel"),
                vmem_limit_bytes=vmem_limit,
            ),
        )(x, gamma, beta)

    # Lane-dense path for F % 128 != 0: put the entire normalized group (C*F)
    # on the lane axis. One transpose each way in the wrapper trades an extra
    # HBM pass for full 128-lane loads/stores and VPU passes (vs masked vst +
    # 128/F VALU inflation in the NCHW block layout).
    G = C * F
    R = B * T
    x_rows = jnp.transpose(x, (0, 2, 1, 3)).reshape(R, G)
    g_rows = gamma.reshape(1, G)
    b_rows = beta.reshape(1, G)
    tR = _pick_tile_rows(R, G, itemsize, budget_bytes=budget,
                         min_steps=_MIN_GRID_STEPS)
    grid = (pl.cdiv(R, tR),)
    kernel = functools.partial(_ln_rows_kernel, eps=eps)
    out_rows = pl.pallas_call(
        kernel,
        out_shape=jax.ShapeDtypeStruct((R, G), x.dtype),
        grid_spec=pltpu.PrefetchScalarGridSpec(
            num_scalar_prefetch=0,
            grid=grid,
            in_specs=[
                pl.BlockSpec((tR, G), lambda i: (i, 0)),
                pl.BlockSpec((1, G), lambda i: (0, 0)),
                pl.BlockSpec((1, G), lambda i: (0, 0)),
            ],
            out_specs=pl.BlockSpec((tR, G), lambda i: (i, 0)),
        ),
        compiler_params=pltpu.CompilerParams(
            dimension_semantics=("parallel",),
            vmem_limit_bytes=vmem_limit,
        ),
    )(x_rows, g_rows, b_rows)
    return jnp.transpose(out_rows.reshape(B, T, C, F), (0, 2, 1, 3))


# ------------------------------- checks --------------------------------------

if __name__ == "__main__":
    key = jax.random.PRNGKey(0)
    kx, kg, kb, kx2 = jax.random.split(key, 4)
    eps = 1e-5

    def ref_fn(x, gamma, beta):
        mu = jnp.mean(x, axis=(1, 3), keepdims=True)
        var = jnp.mean((x - mu) ** 2, axis=(1, 3), keepdims=True)
        return (x - mu) / jnp.sqrt(var + eps) * gamma + beta

    # Case 1: module shapes with F < 128 (lane-dense row path); default init.
    B, C, T, F = 2, 4, 8, 32
    x = jax.random.normal(kx, (B, C, T, F), dtype=jnp.float32)
    gamma1 = jnp.ones((1, C, 1, F), dtype=jnp.float32)
    beta1 = jnp.zeros((1, C, 1, F), dtype=jnp.float32)
    out1 = jax.block_until_ready(layer_norm_4d_cf(x, gamma1, beta1, eps=eps))
    assert out1.shape == (B, C, T, F)
    assert jnp.max(jnp.abs(out1 - ref_fn(x, gamma1, beta1))) < 1e-4

    # Case 2: same shapes, non-trivial gamma/beta (affine path).
    gamma2 = 1.0 + 0.1 * jax.random.normal(kg, (1, C, 1, F), dtype=jnp.float32)
    beta2 = 0.1 * jax.random.normal(kb, (1, C, 1, F), dtype=jnp.float32)
    out2 = jax.block_until_ready(layer_norm_4d_cf(x, gamma2, beta2, eps=eps))
    assert jnp.max(jnp.abs(out2 - ref_fn(x, gamma2, beta2))) < 1e-4

    # Case 3: F multiple of 128 exercises the transpose-free NCHW-native path.
    B3, C3, T3, F3 = 2, 4, 16, 128
    x3 = jax.random.normal(kx2, (B3, C3, T3, F3), dtype=jnp.float32)
    gamma3 = jnp.ones((1, C3, 1, F3), dtype=jnp.float32)
    beta3 = jnp.zeros((1, C3, 1, F3), dtype=jnp.float32)
    out3 = jax.block_until_ready(layer_norm_4d_cf(x3, gamma3, beta3, eps=eps))
    assert out3.shape == (B3, C3, T3, F3)
    assert jnp.max(jnp.abs(out3 - ref_fn(x3, gamma3, beta3))) < 1e-4

    print("KERNEL_OK")
</pallas_src>

<mosaic_0001>
module attributes {stable_mosaic.version = 11 : i64} {
  func.func @_ln_rows_kernel(%arg0: i32, %arg1: memref<8x128xf32, #tpu.memory_space<vmem>>, %arg2: memref<1x128xf32, #tpu.memory_space<vmem>>, %arg3: memref<1x128xf32, #tpu.memory_space<vmem>>, %arg4: memref<8x128xf32, #tpu.memory_space<vmem>>) attributes {dimension_semantics = [#tpu.dimension_semantics<parallel>], iteration_bounds = array<i64: 2>, scalar_prefetch = 0 : i64, scratch_operands = 0 : i64, tpu.core_type = #tpu.core_type<tc>, window_params = [{transform_indices = @transform_0, window_bounds = array<i64: 8, 128>}, {pipeline_mode = #tpu.pipeline_mode<synchronous>, transform_indices = @transform_1, window_bounds = array<i64: 1, 128>}, {pipeline_mode = #tpu.pipeline_mode<synchronous>, transform_indices = @transform_2, window_bounds = array<i64: 1, 128>}, {transform_indices = @transform_3, window_bounds = array<i64: 8, 128>}]} {
    %c0 = arith.constant 0 : index
    %c0_0 = arith.constant 0 : index
    %0 = vector.load %arg1[%c0, %c0_0] : memref<8x128xf32, #tpu.memory_space<vmem>>, vector<8x128xf32>
    %cst = arith.constant dense<0.000000e+00> : vector<8xf32>
    %1 = vector.multi_reduction <add>, %0, %cst [1] : vector<8x128xf32> to vector<8xf32>
    %2 = vector.shape_cast %1 : vector<8xf32> to vector<8x1xf32>
    %cst_1 = arith.constant 1.280000e+02 : f32
    %3 = vector.broadcast %cst_1 : f32 to vector<8x1xf32>
    %4 = arith.divf %2, %3 : vector<8x1xf32>
    %5 = vector.broadcast %4 : vector<8x1xf32> to vector<8x128xf32>
    %6 = arith.subf %0, %5 : vector<8x128xf32>
    %7 = arith.mulf %6, %6 : vector<8x128xf32>
    %cst_2 = arith.constant dense<0.000000e+00> : vector<8xf32>
    %8 = vector.multi_reduction <add>, %7, %cst_2 [1] : vector<8x128xf32> to vector<8xf32>
    %9 = vector.shape_cast %8 : vector<8xf32> to vector<8x1xf32>
    %cst_3 = arith.constant 1.280000e+02 : f32
    %10 = vector.broadcast %cst_3 : f32 to vector<8x1xf32>
    %11 = arith.divf %9, %10 : vector<8x1xf32>
    %cst_4 = arith.constant 9.99999974E-6 : f32
    %12 = vector.broadcast %cst_4 : f32 to vector<8x1xf32>
    %13 = arith.addf %11, %12 : vector<8x1xf32>
    %14 = math.rsqrt %13 : vector<8x1xf32>
    %15 = vector.broadcast %14 : vector<8x1xf32> to vector<8x128xf32>
    %16 = arith.mulf %6, %15 : vector<8x128xf32>
    %c0_5 = arith.constant 0 : index
    %c0_6 = arith.constant 0 : index
    %17 = vector.load %arg2[%c0_5, %c0_6] : memref<1x128xf32, #tpu.memory_space<vmem>>, vector<1x128xf32>
    %18 = vector.broadcast %17 : vector<1x128xf32> to vector<8x128xf32>
    %19 = arith.mulf %16, %18 : vector<8x128xf32>
    %c0_7 = arith.constant 0 : index
    %c0_8 = arith.constant 0 : index
    %20 = vector.load %arg3[%c0_7, %c0_8] : memref<1x128xf32, #tpu.memory_space<vmem>>, vector<1x128xf32>
    %21 = vector.broadcast %20 : vector<1x128xf32> to vector<8x128xf32>
    %22 = arith.addf %19, %21 : vector<8x128xf32>
    %c0_9 = arith.constant 0 : index
    %c0_10 = arith.constant 0 : index
    %23 = vector.load %arg4[%c0_9, %c0_10] : memref<8x128xf32, #tpu.memory_space<vmem>>, vector<8x128xf32>
    tpu.vector_store %arg4[%c0_9, %c0_10], %22 {strides = array<i32>} : memref<8x128xf32, #tpu.memory_space<vmem>>, vector<8x128xf32>,
    return
  }
  func.func @transform_0(%arg0: i32) -> (i32, i32) {
    %c0_i32 = arith.constant 0 : i32
    %c0_i32_0 = arith.constant 0 : i32
    return %arg0, %c0_i32 : i32, i32
  }
  func.func @transform_1(%arg0: i32) -> (i32, i32) {
    %c0_i32 = arith.constant 0 : i32
    %c0_i32_0 = arith.constant 0 : i32
    %c0_i32_1 = arith.constant 0 : i32
    return %c0_i32, %c0_i32_0 : i32, i32
  }
  func.func @transform_2(%arg0: i32) -> (i32, i32) {
    %c0_i32 = arith.constant 0 : i32
    %c0_i32_0 = arith.constant 0 : i32
    %c0_i32_1 = arith.constant 0 : i32
    return %c0_i32, %c0_i32_0 : i32, i32
  }
  func.func @transform_3(%arg0: i32) -> (i32, i32) {
    %c0_i32 = arith.constant 0 : i32
    %c0_i32_0 = arith.constant 0 : i32
    return %arg0, %c0_i32 : i32, i32
  }
}

</mosaic_0001>

<bundles_post_ra>
// kernel: tpu_custom_call.1
= control target key start
LH: loop header
LB: loop body
LE: loop exit
PB: predicated region body
PF: predicated region fallthrough
CT: control target
= control target key end

     0   :  { %8 = vsyncpa [#allocation3], 0  ;;  %s649_s0 = inlined_call_operand.hbm [shape: f32[16,128], index: 0, kind: input, shape index: {}]   ;;  %s650_s1 = inlined_call_operand.vmem [shape: f32[1,128], index: 1, kind: input, shape index: {}]   ;;  %s651_s2 = inlined_call_operand.vmem [shape: f32[1,128], index: 2, kind: input, shape index: {}]   ;;  %s652_s3 = inlined_call_operand.hbm [shape: f32[16,128], index: 3, kind: output, shape index: {}]  }
   0x1   :  { %10 = vsyncpa [#allocation3 + $0x1], 0 }
   0x2   :  { %11 = vsyncpa [#allocation4], 0 }
   0x3   :  { %13 = vsyncpa [#allocation4 + $0x1], 0  ;;  %s482_s12 = smov 0   ;;  %s484_s13 = smov 0  }
   0x4   :  { %s486_s14 = smov 0   ;;  %s488_s15 = smov 0  }
   0x5 LB: > { %s503_s16 = sadd.s32 4294967295, %s458_s15   ;;  %s300_s17 = sadd.s32 4294967294, %s458_s15   ;;  %s458_s15 = sphi %s488_s15, %s667_s15   ;;  %s454_s14 = sphi %s486_s14, %s666_s14   ;;  %s450_s13 = sphi %s484_s13, %s665_s13   ;;  %s446_s12 = sphi %s482_s12, %s664_s12  }
   0x6   : > { %s507_s18 = sadd.s32 1, %s458_s15   ;;  %s26_s19 = sadd.s32 1, %s454_s14 }
   0x7   : > { %s23_s20 = ssub.s32 %s458_s15, %s507_s18  ;;  %p33_p0 = scmp.ne.s32.totalorder %s454_s14, %s450_s13 }
   0x8   : > { %p24_p1 = scmp.eq.s32.totalorder %s23_s20, 0  ;;  %p34_p2 = scmp.eq.s32.totalorder %s458_s15, 0 }
   0x9   : > { %p39_p3 = scmp.ne.s32.totalorder %s450_s13, %s446_s12  ;;  %p40_p4 = scmp.eq.s32.totalorder %s503_s16, 0 }
   0xa   : > { %s519_s21 = scalar_select %p24_p1, %s454_s14, %s26_s19  }
   0xb   : > { %p521_p5 = por %p34_p2, %p33_p0  ;;  %p525_p6 = por %p40_p4, %p39_p3 }
   0xc   : > { %p105_p7 = scmp.eq.s32.totalorder %s503_s16, 1  ;;  %p111_p8 = scmp.eq.s32.totalorder %s300_s17, 1 }
   0xd   : > { %p326_p10 = scmp.lt.s32.totalorder %s458_s15, 2  ;;  %s137_s26 = sand.u32 1, %s454_s14  }
   0xe   : > { %p532_p11 = por %p105_p7, %p33_p0  ;;  %p536_p12 = por %p111_p8, %p39_p3 }
   0xf   : > { %s304_s27 = sshll.u32 %s458_s15, 7  ;;  %s303_s28 = sshll.u32 %s137_s26, 3 }
  0x10   : > { %s656_s24 = scalar_select %p532_p11, 1, 0 }
  0x11   : > { %s657_s25 = scalar_select %p536_p12, 1, 0 }
  0x12   : > { %s545_s4 = scalar_lea.hbm %s649_s0, %s304_s27  ;;  %s141_s5 = scalar_lea.vmem [#allocation2], %s303_s28 }
  0x13   : > { %s148_s6 = sshll.u32 %s141_s5, 4  ;;  %p549_p13 = pnand %p326_p10, %p521_p5  ;;  %s553_s6 = int_to_ptr.vmem [resolvable:$true] %s148_s6 }
  0x14   : > { %s138_s8 = scalar_lea.sflag [#allocation3], %s137_s26  ;;  %s362_s9 = scalar_lea.hbm %s545_s4, 128 }
  0x15   : > { %p363_p2 = scmp.ne.s32.totalorder %s545_s4, %s362_s9  ;;  %p364_p3 = pneg %p549_p13 }
  0x16   : > { %s367_s17 = scalar_lea.hbm %s649_s0, 256  ;;  %p368_p5 = scmp.lt.u32.totalorder %s545_s4, %s649_s0 }
  0x17   : > { %p365_p4 = pnand %p364_p3, %p363_p2  ;;  %p369_p8 = scmp.lt.u32.totalorder %s367_s17, %s362_s9 }
  0x18   : > { %p371_p9 = scmp.lt.u32.totalorder %s362_s9, %s545_s4 }
  0x19   : > { %p366_p7 = pneg %p365_p4  ;;  %p370_p10 = por %p369_p8, %p368_p5 }
  0x1b   : > { %p372_p0 = por %p371_p9, %p370_p10 }
  0x1d   : > { %p373_p1 = pnand %p372_p0, %p366_p7 }
  0x1f   : > { %376 = shalt.err (!%p373_p1)
}
  0x20   : > { %s377_s22 = scalar_lea.vmem %s553_s6, 128  ;;  %s460_s26 = smov [#allocation2]  }
  0x21   : > { %p378_p2 = scmp.ne.s32.totalorder %s553_s6, %s377_s22  ;;  %s382_s27 = sshll.u32 %s460_s26, 4  ;;  %s383_s27 = int_to_ptr.vmem [resolvable:$false] %s382_s27 }
  0x22   : > { %s384_s28 = scalar_lea.vmem %s383_s27, 256  ;;  %p385_p11 = scmp.lt.s32.totalorder %s553_s6, %s383_s27 }
  0x23   : > { %p380_p4 = pnand %p378_p2, %p364_p3  ;;  %p386_p5 = scmp.lt.s32.totalorder %s384_s28, %s377_s22 }
  0x25   : > { %p381_p12 = pneg %p380_p4  ;;  %p387_p8 = por %p386_p5, %p385_p11 }
  0x27   : > { %p388_p9 = pnand %p387_p8, %p381_p12 }
  0x29   : > { %391 = shalt.err (!%p388_p9)
}
  0x2a   : > { %321 = dma.hbm_to_vmem [thread:$0]  (!%p549_p13), %s545_s4, 128, %s553_s6, %s138_s8  }
  0x2b   : > { %p659_p0 = scmp.lt.s32.totalorder %s458_s15, 3  ;;  %p660_p1 = scmp.ge.s32.totalorder %s458_s15, 1 }
  0x2d   : > { %p154_p3 = pnand %p660_p1, %p659_p0 }
  0x2e   : > { %s587_s29 = sand.u32 (!%p154_p3), 1, %s450_s13  }
  0x2f   : > { %157 = sbr.rel (%p154_p3) target bundleno = 381 (0x17d), region = 32  ;;  %s306_s30 = sshll.u32 (!%p154_p3), %s587_s29, 3 }
  0x30   : > { %s160_s5 = scalar_lea.sflag (!%p154_p3), [#allocation3], %s587_s29  ;;  %s163_s9 = scalar_lea.vmem (!%p154_p3), [#allocation2], %s306_s30 }
  0x36   : > { %437 = dma.done.wait (%p525_p6), %s160_s5, 128  }
  0x37   : > { %439 = vsyncadd (%p525_p6), %s160_s5, 4294967168  ;;  %v186_v0 = vld [vmem:[%s163_s9] sm:$0xff]  ;;  %s311_s8 = sshll.u32 %s503_s16, 7  ;;  %s185_s10 = scalar_lea.vmem [#allocation5], %s306_s30 }
  0x38   : > { %187 = vadd.xlane.f32.xlu0 %v186_v0  ;;  %v308_v9 = vld [vmem:[%s650_s1] ss:$0 sm:$0xff]  ;;  %s230_s11 = sshll.u32 %s185_s10, 4  ;;  %s605_s20 = scalar_lea.hbm %s652_s3, %s311_s8  ;;  %s607_s11 = int_to_ptr.vmem [resolvable:$true] %s230_s11 }
  0x39   : > { %v309_v11 = vld [vmem:[%s651_s2] ss:$0 sm:$0xff]  ;;  %s217_s22 = scalar_lea.sflag [#allocation4], %s587_s29  ;;  %s392_s26 = scalar_lea.vmem %s607_s11, 128 }
  0x3a   : > { %p393_p6 = scmp.ne.s32.totalorder %s607_s11, %s392_s26  ;;  %p661_p11 = scmp.ne.s32.totalorder %s656_s24, 0 }
  0x3b   : > { %s461_s16 = smov [#allocation5]  }
  0x3c   : > { %p394_p12 = pnand %p393_p6, %p661_p11  ;;  %s396_s27 = sshll.u32 %s461_s16, 4  ;;  %s397_s27 = int_to_ptr.vmem [resolvable:$false] %s396_s27 }
  0x3d   : > { %s398_s28 = scalar_lea.vmem %s397_s27, 256  ;;  %p399_p7 = scmp.lt.s32.totalorder %s607_s11, %s397_s27 }
  0x3e   : > { %p395_p13 = pneg %p394_p12  ;;  %p400_p10 = scmp.lt.s32.totalorder %s398_s28, %s392_s26 }
  0x40   : > { %p401_p2 = por %p400_p10, %p399_p7 }
  0x42   : > { %p402_p4 = pnand %p401_p2, %p395_p13 }
  0xc5   : > { %v188_v1 = vpop.xlane.xlu0 %187 }
  0xc6   : > { %v190_v2 = vmul.f32 0.0078125, %v188_v1 }
  0xc8   : > { %v191_v3 = vsub.f32 %v186_v0, %v190_v2 }
  0xca   : > { %v192_v4 = vmul.f32 %v191_v3, %v191_v3 }
  0xcc   : > { %193 = vadd.xlane.f32.xlu0 %v192_v4 }
 0x159   : > { %v194_v5 = vpop.xlane.xlu0 %193 }
 0x15a   : > { %v195_v6 = vmul.f32 0.0078125, %v194_v5 }
 0x15c   : > { %v196_v7 = vadd.f32 1e-05, %v195_v6 }
 0x15e   : > { %360 = vrsqrt.f32 %v196_v7 }
 0x168   : > { %v361_v8 = vpop.eup %360 }
 0x169   : > { %v198_v10 = vmul.f32 %v361_v8, %v191_v3 }
 0x16b   : > { %v206_v12 = vmul.f32 %v308_v9, %v198_v10 }
 0x16d   : > { %v214_v13 = vadd.f32 %v309_v11, %v206_v12 }
 0x16f   : > { %215 = vst [vmem:[%s185_s10] sm:$0xff] %v214_v13 }
 0x170   : > { %405 = shalt.err (!%p402_p4)
}
 0x171   : > { %s406_s29 = scalar_lea.hbm %s605_s20, 128  ;;  %s410_s9 = scalar_lea.hbm %s652_s3, 256 }
 0x172   : > { %p407_p5 = scmp.ne.s32.totalorder %s605_s20, %s406_s29  ;;  %p411_p0 = scmp.lt.u32.totalorder %s605_s20, %s652_s3 }
 0x173   : > { %p412_p1 = scmp.lt.u32.totalorder %s410_s9, %s406_s29  ;;  %p414_p6 = scmp.lt.u32.totalorder %s406_s29, %s605_s20 }
 0x174   : > { %p408_p8 = pnand %p407_p5, %p661_p11 }
 0x175   : > { %p413_p3 = por %p412_p1, %p411_p0 }
 0x176   : > { %p409_p9 = pneg %p408_p8 }
 0x177   : > { %p415_p12 = por %p414_p6, %p413_p3 }
 0x179   : > { %p416_p13 = pnand %p415_p12, %p409_p9 }
 0x17b   : > { %419 = shalt.err (!%p416_p13)
}
 0x17c   : > { %316 = dma.vmem_to_hbm [thread:$0]  (%p661_p11), %s607_s11, 128, %s605_s20, %s217_s22  }
 0x17d PF: > { %s242_s23 = sand.u32 1, %s446_s12   ;;  %p662_p7 = scmp.ne.s32.totalorder %s657_s25, 0 }
 0x17e   : > { %p663_p10 = scmp.ge.s32.totalorder %s458_s15, 2  ;;  %s243_s7 = scalar_lea.sflag [#allocation4], %s242_s23 }
 0x180   : > { %p323_p2 = pnand %p663_p10, %p662_p7 }
 0x182   : > { %441 = dma.done.wait (!%p323_p2), %s243_s7, 128  }
 0x183   : > { %443 = vsyncadd (!%p323_p2), %s243_s7, 4294967168  ;;  %p16_p4 = scmp.ge.s32.totalorder %s507_s18, 4   ;;  %s664_s12 = smov %s450_s13 }
 0x184   : > { %s665_s13 = smov %s454_s14  ;;  %s666_s14 = smov %s519_s21 }
 0x185   : > { %s667_s15 = smov %s507_s18  ;;  %18 = sbr.rel (!%p16_p4) target bundleno = 5 (0x5), region = 77 }
 0x18c   :  { %248 = vsyncpa [#allocation3], 1 }
 0x18d   :  { %250 = vsyncpa [#allocation3 + $0x1], 1 }
 0x18e   :  { %251 = vsyncpa [#allocation4], 1 }
 0x18f   :  { %253 = vsyncpa [#allocation4 + $0x1], 1 }

</bundles_post_ra>
